<compile_context>
chip_gen: v7x
topology: tpu7x:2x2x1
jax: 0.10.0
libtpu: 0.0.40
codegen_flags: <defaults>
</compile_context>

<pallas_src>
import functools

import jax
import jax.numpy as jnp
from jax.experimental import pallas as pl
from jax.experimental.pallas import tpu as pltpu


def _cdiv(a, b):
    return -(-a // b)


def _round_up(a, b):
    return _cdiv(a, b) * b


def _twoafc_kernel(c0_ref, c1_ref, w_ref, o_ref, acc_ref, *,
                   inv_b, b_true, f_true, bt, ft,
                   mask_rows, mask_cols, weight_at_finalize):
    p = pl.program_id(0)           # partial (TensorCore shard) index
    nb = pl.program_id(1)          # batch-tile index (reduction)
    nf = pl.program_id(2)          # feature-tile index (reduction, innermost)
    NB = pl.num_programs(1)
    NF = pl.num_programs(2)

    @pl.when(jnp.logical_and(nb == 0, nf == 0))
    def _init():
        acc_ref[...] = jnp.zeros_like(acc_ref)

    # (c0 - c1) upcast to f32 in-register (VPU).
    diff = c0_ref[...].astype(jnp.float32) - c1_ref[...].astype(jnp.float32)

    # In-kernel masking of ragged edge tiles (replaces wrapper jnp.pad).
    # Emitted only when the true shape doesn't divide the tiles; garbage data
    # in the clipped-DMA region (possibly non-finite stale VMEM) is zeroed
    # before the reduce.
    if mask_rows:
        row_start = (p * NB + nb) * bt
        rows = jax.lax.broadcasted_iota(jnp.int32, diff.shape, 0) + row_start
        diff = jnp.where(rows < b_true, diff, 0.0)
    if mask_cols:
        col_start = nf * ft
        cols = jax.lax.broadcasted_iota(jnp.int32, diff.shape, 1) + col_start
        diff = jnp.where(cols < f_true, diff, 0.0)

    # Sublane reduce over batch rows (XLU) -> (1, ft) column sums.
    col_sums = jnp.sum(diff, axis=0, keepdims=True)

    if weight_at_finalize:
        # NF == 1: decouple the weight from the streaming loop entirely.
        acc_ref[...] += col_sums
    else:
        # NF > 1: lane-dense weighted accumulate (pure VPU); MXU never touched.
        acc_ref[...] += col_sums * w_ref[...].astype(jnp.float32)

    # Write this core's partial exactly once, at its last reduction step.
    @pl.when(jnp.logical_and(nb == NB - 1, nf == NF - 1))
    def _finalize():
        acc = acc_ref[...]
        if weight_at_finalize:
            acc = acc * w_ref[...].astype(jnp.float32)
        part = jnp.sum(acc, axis=1, keepdims=True) * inv_b   # (1, 1)
        o_ref[...] = part[None]                              # (1, 1, 1)


def twoafc_forward(class_0, class_1, decoder_weight, *,
                   batch_tile=None, feature_tile=None, num_partials=1,
                   block_bytes=8 << 20, vmem_limit_bytes=48 << 20):
    """class_0, class_1: (B, F); decoder_weight: (1, F) like nn.Linear(F, 1, bias=False).

    num_partials=1 on single-TC chips (v5e/v6e); use 2 on v7x to shard the
    leading "parallel" grid axis across both TensorCores.
    """
    B, F = class_0.shape
    P = max(1, int(num_partials))

    itemsize = jnp.dtype(class_0.dtype).itemsize
    sub = max(8, 32 // itemsize)          # dtype-aware sublane multiple

    # ---- Feature tiling: prefer NF == 1 (one contiguous linear DMA / block).
    if feature_tile is None:
        ft = F if sub * F * itemsize <= block_bytes else \
            max(128, (block_bytes // (sub * itemsize)) // 128 * 128)
    else:
        ft = feature_tile
    if ft >= F:
        ft, NF, F_pad = F, 1, F
    else:
        ft = max(128, (ft // 128) * 128)   # non-full feature tiles must be 128-aligned
        NF = _cdiv(F, ft)
        F_pad = NF * ft

    # ---- Batch tiling: largest sublane-aligned tile that keeps the block near
    #      block_bytes (2 inputs x 2 pipeline buffers must fit vmem_limit).
    bt_fit = max(sub, (block_bytes // max(1, ft * itemsize)) // sub * sub)
    bt_need = _round_up(_cdiv(B, P), sub)
    bt = min(bt_fit, bt_need)
    if batch_tile is not None:
        bt = min(bt, _round_up(batch_tile, sub))
    bt = max(sub, bt)
    NB = _cdiv(B, P * bt)

    mask_rows = P * NB * bt != B
    mask_cols = F_pad != F
    weight_at_finalize = (NF == 1)

    # Keep the weight lane-major (1, F); pad only this tiny row if F is ragged.
    w_row = decoder_weight.reshape(1, F)
    if F_pad != F:
        w_row = jnp.pad(w_row, ((0, 0), (0, F_pad - F)))

    # Clamp the batch block index so a partial that starts past B never issues
    # a fully out-of-range DMA (its rows are zeroed by the in-kernel row mask).
    n_valid_b_blocks = _cdiv(B, bt)
    if P * NB > n_valid_b_blocks:
        def in_idx(p, nb, nf):
            return (jnp.minimum(p * NB + nb, n_valid_b_blocks - 1), nf)
    else:
        def in_idx(p, nb, nf):
            return (p * NB + nb, nf)

    cost = pl.CostEstimate(
        flops=3 * B * F + 2 * F,
        transcendentals=0,
        bytes_accessed=2 * B * F * itemsize
        + F_pad * jnp.dtype(w_row.dtype).itemsize + P * 4,
    )

    kernel = functools.partial(
        _twoafc_kernel,
        inv_b=1.0 / B, b_true=B, f_true=F, bt=bt, ft=ft,
        mask_rows=mask_rows, mask_cols=mask_cols,
        weight_at_finalize=weight_at_finalize)

    partials = pl.pallas_call(
        kernel,
        out_shape=jax.ShapeDtypeStruct((P, 1, 1), jnp.float32),
        grid=(P, NB, NF),
        in_specs=[
            pl.BlockSpec((bt, ft), in_idx),
            pl.BlockSpec((bt, ft), in_idx),
            pl.BlockSpec((1, ft), lambda p, nb, nf: (0, nf)),
        ],
        out_specs=pl.BlockSpec((1, 1, 1), lambda p, nb, nf: (p, 0, 0)),
        scratch_shapes=[pltpu.VMEM((1, ft), jnp.float32)],
        compiler_params=pltpu.CompilerParams(
            dimension_semantics=("parallel", "arbitrary", "arbitrary"),
            vmem_limit_bytes=vmem_limit_bytes),
        cost_estimate=cost,
    )(class_0, class_1, w_row)

    # Each per-core partial is already divided by the true batch size.
    return jnp.sum(partials[:, 0, 0])


def _ref(c0, c1, w_row, B):
    # Elementwise reference (avoids TPU default reduced-precision f32 matmul).
    d = c0.astype(jnp.float32) - c1.astype(jnp.float32)
    return jnp.sum(d * w_row.astype(jnp.float32)) / B


if __name__ == "__main__":
    key = jax.random.PRNGKey(0)

    # --- small case matching the module (batch=8, nfeatures=32) ---
    B, F = 8, 32
    k0, k1, kw, k2 = jax.random.split(key, 4)
    class_0 = jax.random.normal(k0, (B, F), dtype=jnp.float32)
    class_1 = jax.random.normal(k1, (B, F), dtype=jnp.float32)
    bound = 1.0 / (F ** 0.5)               # nn.Linear default init range
    decoder_weight = jax.random.uniform(kw, (1, F), dtype=jnp.float32,
                                        minval=-bound, maxval=bound)

    result = twoafc_forward(class_0, class_1, decoder_weight)
    result = jax.block_until_ready(result)
    ref = _ref(class_0, class_1, decoder_weight, B)
    assert jnp.allclose(result, ref, atol=1e-5, rtol=1e-5), (result, ref)

    # --- ragged multi-tile case (in-kernel row+col masking, no wrapper pad) ---
    B2, F2 = 100, 300
    ka, kb, kw2, k3 = jax.random.split(k2, 4)
    c0 = jax.random.normal(ka, (B2, F2), dtype=jnp.float32)
    c1 = jax.random.normal(kb, (B2, F2), dtype=jnp.float32)
    bound2 = 1.0 / (F2 ** 0.5)
    w2 = jax.random.uniform(kw2, (1, F2), dtype=jnp.float32,
                            minval=-bound2, maxval=bound2)
    result2 = twoafc_forward(c0, c1, w2, batch_tile=16, feature_tile=128)
    result2 = jax.block_until_ready(result2)
    ref2 = _ref(c0, c1, w2, B2)
    assert jnp.allclose(result2, ref2, atol=1e-5, rtol=1e-5), (result2, ref2)

    # --- bf16 case (dtype-aware sublane rounding + ragged batch) ---
    B3, F3 = 24, 256
    kc, kd, kw3 = jax.random.split(k3, 3)
    c0b = jax.random.normal(kc, (B3, F3), dtype=jnp.bfloat16)
    c1b = jax.random.normal(kd, (B3, F3), dtype=jnp.bfloat16)
    bound3 = 1.0 / (F3 ** 0.5)
    w3 = jax.random.uniform(kw3, (1, F3), dtype=jnp.float32,
                            minval=-bound3, maxval=bound3)
    result3 = twoafc_forward(c0b, c1b, w3)
    result3 = jax.block_until_ready(result3)
    ref3 = _ref(c0b, c1b, w3, B3)
    assert jnp.allclose(result3, ref3, atol=1e-3, rtol=1e-3), (result3, ref3)

    print("KERNEL_OK")
</pallas_src>

<mosaic_0001>
module attributes {stable_mosaic.version = 11 : i64} {
  func.func @_twoafc_kernel(%arg0: i32, %arg1: i32, %arg2: i32, %arg3: memref<8x32xf32, #tpu.memory_space<vmem>>, %arg4: memref<8x32xf32, #tpu.memory_space<vmem>>, %arg5: memref<1x32xf32, #tpu.memory_space<vmem>>, %arg6: memref<1x1x1xf32, #tpu.memory_space<vmem>>, %arg7: memref<1x32xf32, #tpu.memory_space<vmem>>) attributes {dimension_semantics = [#tpu.dimension_semantics<parallel>, #tpu.dimension_semantics<arbitrary>, #tpu.dimension_semantics<arbitrary>], iteration_bounds = array<i64: 1, 1, 1>, scalar_prefetch = 0 : i64, scratch_operands = 1 : i64, tpu.core_type = #tpu.core_type<tc>, window_params = [{transform_indices = @transform_0, window_bounds = array<i64: 8, 32>}, {transform_indices = @transform_1, window_bounds = array<i64: 8, 32>}, {transform_indices = @transform_2, window_bounds = array<i64: 1, 32>}, {transform_indices = @transform_3, window_bounds = array<i64: 1, 1, 1>}]} {
    %c0_i32 = arith.constant 0 : i32
    %0 = arith.cmpi eq, %arg1, %c0_i32 : i32
    %c0_i32_0 = arith.constant 0 : i32
    %1 = arith.cmpi eq, %arg2, %c0_i32_0 : i32
    %2 = arith.andi %0, %1 : i1
    %3 = arith.extui %2 : i1 to i32
    %c0_i32_1 = arith.constant 0 : i32
    %4 = arith.cmpi ne, %3, %c0_i32_1 : i32
    scf.if %4 {
      %cst_12 = arith.constant 0.000000e+00 : f32
      %18 = vector.broadcast %cst_12 : f32 to vector<1x32xf32>
      %c0_13 = arith.constant 0 : index
      %c0_14 = arith.constant 0 : index
      %19 = vector.load %arg7[%c0_13, %c0_14] : memref<1x32xf32, #tpu.memory_space<vmem>>, vector<1x32xf32>
      tpu.vector_store %arg7[%c0_13, %c0_14], %18 {strides = array<i32>} : memref<1x32xf32, #tpu.memory_space<vmem>>, vector<1x32xf32>,
    } else {
    }
    %c0 = arith.constant 0 : index
    %c0_2 = arith.constant 0 : index
    %5 = vector.load %arg3[%c0, %c0_2] : memref<8x32xf32, #tpu.memory_space<vmem>>, vector<8x32xf32>
    %c0_3 = arith.constant 0 : index
    %c0_4 = arith.constant 0 : index
    %6 = vector.load %arg4[%c0_3, %c0_4] : memref<8x32xf32, #tpu.memory_space<vmem>>, vector<8x32xf32>
    %7 = arith.subf %5, %6 : vector<8x32xf32>
    %cst = arith.constant dense<0.000000e+00> : vector<32xf32>
    %8 = vector.multi_reduction <add>, %7, %cst [0] : vector<8x32xf32> to vector<32xf32>
    %9 = vector.shape_cast %8 : vector<32xf32> to vector<1x32xf32>
    %c0_5 = arith.constant 0 : index
    %c0_6 = arith.constant 0 : index
    %10 = vector.load %arg7[%c0_5, %c0_6] : memref<1x32xf32, #tpu.memory_space<vmem>>, vector<1x32xf32>
    %11 = arith.addf %10, %9 : vector<1x32xf32>
    %c0_7 = arith.constant 0 : index
    %c0_8 = arith.constant 0 : index
    %12 = vector.load %arg7[%c0_7, %c0_8] : memref<1x32xf32, #tpu.memory_space<vmem>>, vector<1x32xf32>
    tpu.vector_store %arg7[%c0_7, %c0_8], %11 {strides = array<i32>} : memref<1x32xf32, #tpu.memory_space<vmem>>, vector<1x32xf32>,
    %c0_i32_9 = arith.constant 0 : i32
    %13 = arith.cmpi eq, %arg1, %c0_i32_9 : i32
    %c0_i32_10 = arith.constant 0 : i32
    %14 = arith.cmpi eq, %arg2, %c0_i32_10 : i32
    %15 = arith.andi %13, %14 : i1
    %16 = arith.extui %15 : i1 to i32
    %c0_i32_11 = arith.constant 0 : i32
    %17 = arith.cmpi ne, %16, %c0_i32_11 : i32
    scf.if %17 {
      %c0_12 = arith.constant 0 : index
      %c0_13 = arith.constant 0 : index
      %18 = vector.load %arg7[%c0_12, %c0_13] : memref<1x32xf32, #tpu.memory_space<vmem>>, vector<1x32xf32>
      %c0_14 = arith.constant 0 : index
      %c0_15 = arith.constant 0 : index
      %19 = vector.load %arg5[%c0_14, %c0_15] : memref<1x32xf32, #tpu.memory_space<vmem>>, vector<1x32xf32>
      %20 = arith.mulf %18, %19 : vector<1x32xf32>
      %cst_16 = arith.constant dense<0.000000e+00> : vector<1xf32>
      %21 = vector.multi_reduction <add>, %20, %cst_16 [1] : vector<1x32xf32> to vector<1xf32>
      %22 = vector.shape_cast %21 : vector<1xf32> to vector<1x1xf32>
      %cst_17 = arith.constant 1.250000e-01 : f32
      %23 = vector.broadcast %cst_17 : f32 to vector<1x1xf32>
      %24 = arith.mulf %22, %23 : vector<1x1xf32>
      %25 = vector.shape_cast %24 : vector<1x1xf32> to vector<1x1x1xf32>
      %c0_18 = arith.constant 0 : index
      %c0_19 = arith.constant 0 : index
      %c0_20 = arith.constant 0 : index
      %26 = vector.load %arg6[%c0_18, %c0_19, %c0_20] : memref<1x1x1xf32, #tpu.memory_space<vmem>>, vector<1x1x1xf32>
      tpu.vector_store %arg6[%c0_18, %c0_19, %c0_20], %25 {strides = array<i32>} : memref<1x1x1xf32, #tpu.memory_space<vmem>>, vector<1x1x1xf32>,
    } else {
    }
    return
  }
  func.func @transform_0(%arg0: i32, %arg1: i32, %arg2: i32) -> (i32, i32) {
    %c1_i32 = arith.constant 1 : i32
    %0 = arith.muli %arg0, %c1_i32 : i32
    %1 = arith.addi %0, %arg1 : i32
    %c0_i32 = arith.constant 0 : i32
    return %1, %arg2 : i32, i32
  }
  func.func @transform_1(%arg0: i32, %arg1: i32, %arg2: i32) -> (i32, i32) {
    %c1_i32 = arith.constant 1 : i32
    %0 = arith.muli %arg0, %c1_i32 : i32
    %1 = arith.addi %0, %arg1 : i32
    %c0_i32 = arith.constant 0 : i32
    return %1, %arg2 : i32, i32
  }
  func.func @transform_2(%arg0: i32, %arg1: i32, %arg2: i32) -> (i32, i32) {
    %c0_i32 = arith.constant 0 : i32
    %c0_i32_0 = arith.constant 0 : i32
    return %c0_i32, %arg2 : i32, i32
  }
  func.func @transform_3(%arg0: i32, %arg1: i32, %arg2: i32) -> (i32, i32, i32) {
    %c0_i32 = arith.constant 0 : i32
    %c0_i32_0 = arith.constant 0 : i32
    %c0_i32_1 = arith.constant 0 : i32
    return %arg0, %c0_i32, %c0_i32_0 : i32, i32, i32
  }
}

</mosaic_0001>

<bundles_post_ra>
// kernel: tpu_custom_call.1
= control target key start
LH: loop header
LB: loop body
LE: loop exit
PB: predicated region body
PF: predicated region fallthrough
CT: control target
= control target key end

     0   :  { %8 = vsyncpa [#allocation4], 0  ;;  %s239_s0 = inlined_call_operand.hbm [shape: f32[8,32], index: 0, kind: input, shape index: {}]   ;;  %s240_s1 = inlined_call_operand.hbm [shape: f32[8,32], index: 1, kind: input, shape index: {}]   ;;  %s241_s2 = inlined_call_operand.vmem [shape: f32[1,32], index: 2, kind: input, shape index: {}]   ;;  %s242_s3 = inlined_call_operand.hbm [shape: f32[1,1,1], index: 3, kind: output, shape index: {}]  }
   0x1   :  { %9 = vsyncpa [#allocation7], 0 }
   0x2   :  { %10 = vsyncpa [#allocation5], 0  ;;  %s173_s12 = smov [#allocation3]   ;;  %s174_s14 = smov [#allocation6]  }
   0x3   :  { %s20_s13 = sshll.u32 %s173_s12, 4  ;;  %s33_s15 = sshll.u32 %s174_s14, 4  ;;  %s21_s13 = int_to_ptr.vmem [resolvable:$true] %s20_s13  ;;  %s34_s15 = int_to_ptr.vmem [resolvable:$true] %s33_s15 }
   0x4   :  { %s101_s18 = scalar_lea.hbm %s239_s0, 128 }
   0x5   :  { %p102_p0 = scmp.ne.s32.totalorder %s239_s0, %s101_s18  ;;  %p105_p1 = scmp.lt.u32.totalorder %s101_s18, %s239_s0 }
   0x7   :  { %p107_p2 = pnand %p105_p1, %p102_p0 }
   0x9   :  { %110 = shalt.err (!%p107_p2)
}
   0xa   :  { %s111_s23 = scalar_lea.vmem %s21_s13, 128  ;;  %p116_p4 = scmp.lt.s32.totalorder %s21_s13, %s21_s13 }
   0xb   :  { %p112_p3 = scmp.ne.s32.totalorder %s21_s13, %s111_s23  ;;  %p117_p5 = scmp.lt.s32.totalorder %s111_s23, %s111_s23 }
   0xd   :  { %p118_p6 = por %p117_p5, %p116_p4 }
   0xf   :  { %p119_p7 = pnand %p118_p6, %p112_p3 }
  0x11   :  { %122 = shalt.err (!%p119_p7)
}
  0x12   :  { %23 = dma.hbm_to_vmem [thread:$0]  %s239_s0, 128, %s21_s13, [#allocation4]  }
  0x13   :  { %s123_s28 = scalar_lea.hbm %s240_s1, 128 }
  0x14   :  { %p124_p8 = scmp.ne.s32.totalorder %s240_s1, %s123_s28  ;;  %p127_p9 = scmp.lt.u32.totalorder %s123_s28, %s240_s1 }
  0x16   :  { %p129_p10 = pnand %p127_p9, %p124_p8 }
  0x18   :  { %132 = shalt.err (!%p129_p10)
}
  0x19   :  { %s133_s6 = scalar_lea.vmem %s34_s15, 128  ;;  %p138_p12 = scmp.lt.s32.totalorder %s34_s15, %s34_s15 }
  0x1a   :  { %p134_p11 = scmp.ne.s32.totalorder %s34_s15, %s133_s6  ;;  %p139_p13 = scmp.lt.s32.totalorder %s133_s6, %s133_s6 }
  0x1c   :  { %p140_p0 = por %p139_p13, %p138_p12 }
  0x1e   :  { %p141_p1 = pnand %p140_p0, %p134_p11 }
  0x20   :  { %144 = shalt.err (!%p141_p1)
}
  0x21   :  { %36 = dma.hbm_to_vmem [thread:$0]  %s240_s1, 128, %s34_s15, [#allocation7]  }
  0x22   :  { %167 = dma.done.wait [#allocation4], 128  }
  0x23   :  { %168 = vsyncadd [#allocation4], 4294967168 }
  0x24   :  { %169 = dma.done.wait [#allocation7], 128  }
  0x25   :  { %170 = vsyncadd [#allocation7], 4294967168  ;;  %vm53_vm0 = vcmask 253952   ;;  %v175_v0 = vmov 0.0   ;;  %v55_v1 = vld [vmem:[#allocation3] sm:$0xff]  ;;  %v56_v2 = vld [vmem:[#allocation6] sm:$0xff] }
  0x26   :  { %54 = vst.msk [vmem:[#allocation2] sm:$0x1] %vm53_vm0, %v175_v0  ;;  %vm58_vm1 = vcmask 261120   ;;  %v57_v3 = vsub.f32 %v55_v1, %v56_v2  ;;  %v73_v13 = vld [vmem:[%s241_s2] sm:$0x1]  ;;  %s176_s9 = smov [#allocation8]  }
  0x27   :  { %s87_s10 = sshll.u32 %s176_s9, 4  ;;  %vm79_vm2 = vcmask 0   ;;  %s88_s10 = int_to_ptr.vmem [resolvable:$true] %s87_s10 }
  0x28   :  { %v59_v4 = vsel %vm58_vm1, %v57_v3, 0.0  ;;  %s145_s11 = scalar_lea.vmem %s88_s10, 16  ;;  %s149_s12 = scalar_lea.vmem %s88_s10, 32 }
  0x29   :  { %v60_v5 = vrot.slane %v59_v4, 4  ;;  %p146_p2 = scmp.ne.s32.totalorder %s88_s10, %s145_s11  ;;  %p150_p3 = scmp.lt.s32.totalorder %s88_s10, %s88_s10 }
  0x2a   :  { %p151_p4 = scmp.lt.s32.totalorder %s149_s12, %s145_s11 }
  0x2b   :  { %v61_v6 = vadd.f32 %v60_v5, %v59_v4 }
  0x2c   :  { %p152_p5 = por %p151_p4, %p150_p3 }
  0x2d   :  { %v62_v7 = vrot.slane %v61_v6, 2  ;;  %v66_v10 = vld [vmem:[#allocation2] sm:$0x1] }
  0x2e   :  { %p153_p6 = pnand %p152_p5, %p146_p2 }
  0x2f   :  { %v63_v8 = vadd.f32 %v62_v7, %v61_v6 }
  0x31   :  { %v64_v9 = vrot.slane %v63_v8, 1 }
  0x33   :  { %v65_v11 = vadd.f32 %v64_v9, %v63_v8 }
  0x35   :  { %v67_v12 = vadd.f32 %v66_v10, %v65_v11 }
  0x37   :  { %69 = vst.msk [vmem:[#allocation2] sm:$0x1] %vm53_vm0, %v67_v12 }
  0x3e   :  { %v72_v14 = vld [vmem:[#allocation2] sm:$0x1] }
  0x3f   :  { %v74_v15 = vmul.f32 %v73_v13, %v72_v14 }
  0x41   :  { %v75_v16 = vsel %vm53_vm0, %v74_v15, 0.0 }
  0x42   :  { %76 = vadd.xlane.f32.xlu0 %v75_v16 }
  0xcf   :  { %v77_v17 = vpop.xlane.xlu0 %76 }
  0xd0   :  { %v78_v18 = vmul.f32 0.125, %v77_v17 }
  0xd2   :  { %80 = vst.msk [vmem:[#allocation8] sm:$0x1] %vm79_vm2, %v78_v18 }
  0xd3   :  { %156 = shalt.err (!%p153_p6)
}
  0xd4   :  { %s157_s14 = scalar_lea.hbm %s242_s3, 16 }
  0xd5   :  { %p158_p7 = scmp.ne.s32.totalorder %s242_s3, %s157_s14  ;;  %p161_p8 = scmp.lt.u32.totalorder %s157_s14, %s242_s3 }
  0xd7   :  { %p163_p9 = pnand %p161_p8, %p158_p7 }
  0xd9   :  { %166 = shalt.err (!%p163_p9)
}
  0xda   :  { %90 = dma.vmem_to_hbm [thread:$0]  %s88_s10, 16, %s242_s3, [#allocation5]  }
  0xdb   :  { %171 = dma.done.wait [#allocation5], 16  }
  0xdc   :  { %172 = vsyncadd [#allocation5], 4294967280 }
  0xdd   :  { %94 = vsyncpa [#allocation4], 1 }
  0xde   :  { %95 = vsyncpa [#allocation7], 1 }
  0xdf   :  { %96 = vsyncpa [#allocation5], 1 }

</bundles_post_ra>
